<compile_context>
chip_gen: v6e
topology: v6e:2x2x1
jax: 0.10.0
libtpu: 0.0.40
codegen_flags: <defaults>
</compile_context>

<pallas_src>
import functools

import jax
import jax.numpy as jnp
from jax import lax
from jax.experimental import pallas as pl
from jax.experimental.pallas import tpu as pltpu

_BN_EPS = 1e-5


# ----------------------------------------------------------------------------
# pltpu.roll shift-direction probe (run once, eagerly, outside jit) so the
# in-kernel tap-shift construction is robust to the roll convention of the
# installed JAX/Mosaic version.
# ----------------------------------------------------------------------------
def _roll_probe_kernel(x_ref, o_ref):
    o_ref[...] = pltpu.roll(x_ref[...], shift=1, axis=1)


_ROLL_SIGN = None


def _get_roll_sign():
    """Returns sign s.t. pltpu.roll(x, shift=sign*off, axis=1)[..., m] == x[..., m + off]."""
    global _ROLL_SIGN
    if _ROLL_SIGN is None:
        x = jnp.arange(8 * 128, dtype=jnp.float32).reshape(8, 128)
        y = pl.pallas_call(
            _roll_probe_kernel,
            out_shape=jax.ShapeDtypeStruct((8, 128), jnp.float32),
        )(x)
        if bool(jnp.array_equal(y, jnp.roll(x, 1, axis=1))):
            _ROLL_SIGN = -1          # numpy convention: y[m] = x[m - shift]
        elif bool(jnp.array_equal(y, jnp.roll(x, -1, axis=1))):
            _ROLL_SIGN = 1           # opposite convention: y[m] = x[m + shift]
        else:
            raise RuntimeError("unexpected pltpu.roll semantics")
    return _ROLL_SIGN


# ----------------------------------------------------------------------------
# In-kernel 3x3, stride-1, pad-1 convolution of a channel-major activation slab.
# ----------------------------------------------------------------------------
def _conv3x3_taps(src_f32, w_taps_ref, cout, hh, ww, ii, jj, roll_sign):
    """src_f32: (Cin, M) f32 with lane index m = n*hh*ww + i*ww + j.
    w_taps_ref: (9*Cout, Cin) bf16 ref; rows [t*Cout:(t+1)*Cout] hold tap t = di*3+dj
    (BN scale already folded in). Returns the (Cout, M) f32 conv result (no bias)."""
    m_total = src_f32.shape[-1]
    acc = None
    for di in range(3):
        for dj in range(3):
            t = di * 3 + dj
            off = (di - 1) * ww + (dj - 1)
            # shifted[c, m] = src[c, m + off]  (the neighbouring source pixel of output m)
            if off == 0:
                shifted = src_f32
            else:
                shifted = pltpu.roll(src_f32, shift=(roll_sign * off) % m_total, axis=1)
            # zero out taps that fall outside the (zero-padded) image
            cond = None
            if di == 0:
                cond = ii >= 1
            elif di == 2:
                cond = ii < hh - 1
            if dj == 0:
                cond = (jj >= 1) if cond is None else (cond & (jj >= 1))
            elif dj == 2:
                cond = (jj < ww - 1) if cond is None else (cond & (jj < ww - 1))
            tap = shifted if cond is None else jnp.where(cond, shifted, jnp.zeros_like(shifted))
            w_tap = w_taps_ref[t * cout:(t + 1) * cout, :]          # (Cout, Cin) bf16
            prod = jnp.dot(w_tap, tap.astype(jnp.bfloat16),
                           preferred_element_type=jnp.float32)       # MXU, f32 accumulation
            acc = prod if acc is None else acc + prod
    return acc


# ----------------------------------------------------------------------------
# Fused BasicBlock kernels (one pallas_call each)
# ----------------------------------------------------------------------------
def _basic_block_kernel_id(x_ref, w1_ref, b1_ref, w2_ref, b2_ref, o_ref, *,
                           nimg, hh, ww, cout, roll_sign):
    """Stride-1 BasicBlock with identity residual (Cin == Cout)."""
    m_total = nimg * hh * ww
    lane = lax.broadcasted_iota(jnp.int32, (1, m_total), 1)
    jj = lane % ww
    ii = (lane // ww) % hh

    xsrc = x_ref[...].astype(jnp.float32)                            # (C, M)
    h1 = _conv3x3_taps(xsrc, w1_ref, cout, hh, ww, ii, jj, roll_sign) + b1_ref[...]
    h1 = jnp.maximum(h1, 0.0)                                        # conv1 + BN1 + ReLU
    out = _conv3x3_taps(h1, w2_ref, cout, hh, ww, ii, jj, roll_sign) + b2_ref[...]
    out = out + xsrc                                                 # identity residual
    o_ref[...] = jnp.maximum(out, 0.0).astype(o_ref.dtype)           # final ReLU


def _basic_block_kernel_ds(a1t_ref, xst_ref, w1_ref, b1_ref, w2_ref, b2_ref,
                           wd_ref, bd_ref, o_ref, *, nimg, hh, ww, cout, roll_sign):
    """BasicBlock with fused 1x1-conv + BN downsample residual (stride != 1 or Cin != Cout)."""
    m_total = nimg * hh * ww
    lane = lax.broadcasted_iota(jnp.int32, (1, m_total), 1)
    jj = lane % ww
    ii = (lane // ww) % hh

    # conv1 (strided): single GEMM over pre-extracted transposed patches.
    h1 = jnp.dot(w1_ref[...], a1t_ref[...], preferred_element_type=jnp.float32) + b1_ref[...]
    h1 = jnp.maximum(h1, 0.0)                                        # conv1 + BN1 + ReLU
    # conv2 (stride 1): taps built in-kernel, no im2col.
    out = _conv3x3_taps(h1, w2_ref, cout, hh, ww, ii, jj, roll_sign) + b2_ref[...]
    # fused 1x1 downsample + BNd residual (rides in MXU slack, no extra launch / HBM round trip)
    out = out + jnp.dot(wd_ref[...], xst_ref[...], preferred_element_type=jnp.float32) + bd_ref[...]
    o_ref[...] = jnp.maximum(out, 0.0).astype(o_ref.dtype)


# ----------------------------------------------------------------------------
# Block forward wrapper
# ----------------------------------------------------------------------------
def _vmem_spec():
    return pl.BlockSpec(memory_space=pltpu.MemorySpace.VMEM)


def basic_block_forward(x_nchw, prep, out_dtype=jnp.bfloat16):
    """BasicBlock forward. x_nchw: (N, Cin, H, W) -> (N, Cout, Ho, Wo) in `out_dtype`."""
    n, cin, h, w = x_nchw.shape
    s = prep["stride"]
    cout = prep["cout"]
    ho = (h + 2 - 3) // s + 1
    wo = (w + 2 - 3) // s + 1
    m = n * ho * wo
    roll_sign = _get_roll_sign()

    if "wd_mat" not in prep:                                         # identity-residual path
        assert s == 1 and cin == cout
        # channel-major slab (Cin, M) with M in lanes
        x_t = jnp.transpose(x_nchw, (1, 0, 2, 3)).reshape(cin, m).astype(jnp.bfloat16)
        kernel = functools.partial(_basic_block_kernel_id, nimg=n, hh=ho, ww=wo,
                                   cout=cout, roll_sign=roll_sign)
        args = (x_t, prep["w1_taps"], prep["b1"], prep["w2_taps"], prep["b2"])
    else:                                                            # 1x1-conv+BN downsample path
        # transposed im2col for the strided conv1 (plain-JAX glue; see TODO at top)
        xp = jnp.pad(x_nchw, ((0, 0), (0, 0), (1, 1), (1, 1)))
        cols = [xp[:, :, di:di + s * ho:s, dj:dj + s * wo:s]
                for di in range(3) for dj in range(3)]               # 9 x (N, Cin, Ho, Wo)
        a1t = (jnp.stack(cols, axis=0).transpose(0, 2, 1, 3, 4)
               .reshape(9 * cin, m).astype(jnp.bfloat16))            # (9*Cin, M)
        xst = (x_nchw[:, :, ::s, ::s].transpose(1, 0, 2, 3)
               .reshape(cin, m).astype(jnp.bfloat16))                # (Cin, M) for the 1x1 conv
        kernel = functools.partial(_basic_block_kernel_ds, nimg=n, hh=ho, ww=wo,
                                   cout=cout, roll_sign=roll_sign)
        args = (a1t, xst, prep["w1_mat"], prep["b1"], prep["w2_taps"], prep["b2"],
                prep["wd_mat"], prep["bd"])

    out_t = pl.pallas_call(
        kernel,
        out_shape=jax.ShapeDtypeStruct((cout, m), out_dtype),        # lane-dense (M in lanes)
        in_specs=[_vmem_spec() for _ in args],
        out_specs=_vmem_spec(),
    )(*args)
    # channel-major (Cout, N*Ho*Wo) -> NCHW (cheap plain-JAX layout plumbing)
    return out_t.reshape(cout, n, ho, wo).transpose(1, 0, 2, 3)


# ----------------------------------------------------------------------------
# Parameters (deterministic), BN folding, kernel-ready packing (done once)
# ----------------------------------------------------------------------------
def _fold_bn(gamma, beta, mean, var):
    s = gamma / jnp.sqrt(var + _BN_EPS)
    return s, beta - mean * s


def init_basic_block(key, inplanes, planes, stride):
    keys = jax.random.split(key, 6)

    def conv_w(k, o, i, ks):
        return jax.random.normal(k, (o, i, ks, ks), jnp.float32) / jnp.sqrt(i * ks * ks)

    def bn(k, c):
        k1, k2, k3, k4 = jax.random.split(k, 4)
        gamma = 1.0 + 0.1 * jax.random.normal(k1, (c,), jnp.float32)
        beta = 0.1 * jax.random.normal(k2, (c,), jnp.float32)
        mean = 0.1 * jax.random.normal(k3, (c,), jnp.float32)
        var = 1.0 + 0.1 * jnp.abs(jax.random.normal(k4, (c,), jnp.float32))
        return gamma, beta, mean, var

    p = {
        "stride": stride,
        "w1": conv_w(keys[0], planes, inplanes, 3), "bn1": bn(keys[1], planes),
        "w2": conv_w(keys[2], planes, planes, 3), "bn2": bn(keys[3], planes),
    }
    if stride != 1 or inplanes != planes:
        p["dw"] = conv_w(keys[4], planes, inplanes, 1)
        p["dbn"] = bn(keys[5], planes)
    return p


def prep_basic_block(raw):
    """Fold BN scales into bf16 weights and pack them in the layouts the kernels consume."""
    s1, b1 = _fold_bn(*raw["bn1"])
    s2, b2 = _fold_bn(*raw["bn2"])
    w1 = raw["w1"] * s1[:, None, None, None]          # BN1 scale folded into conv1 weights
    w2 = raw["w2"] * s2[:, None, None, None]          # BN2 scale folded into conv2 weights
    cout, cin = w1.shape[0], w1.shape[1]

    p = {
        "stride": raw["stride"], "cin": cin, "cout": cout,
        "b1": b1.reshape(cout, 1).astype(jnp.float32),
        "b2": b2.reshape(cout, 1).astype(jnp.float32),
        # per-tap rows [t*Cout:(t+1)*Cout] = w2[:, :, di, dj], t = di*3+dj
        "w2_taps": jnp.transpose(w2, (2, 3, 0, 1)).reshape(9 * cout, cout).astype(jnp.bfloat16),
    }
    if "dw" in raw:
        sd, bd = _fold_bn(*raw["dbn"])
        wd = raw["dw"] * sd[:, None, None, None]
        p["wd_mat"] = wd[:, :, 0, 0].astype(jnp.bfloat16)                       # (Cout, Cin)
        p["bd"] = bd.reshape(cout, 1).astype(jnp.float32)
        # conv1 consumed as one GEMM: (Cout, 9*Cin), cols ordered t*Cin + ci
        p["w1_mat"] = jnp.transpose(w1, (0, 2, 3, 1)).reshape(cout, 9 * cin).astype(jnp.bfloat16)
    else:
        # conv1 consumed tap-by-tap in-kernel: (9*Cout, Cin)
        p["w1_taps"] = jnp.transpose(w1, (2, 3, 0, 1)).reshape(9 * cout, cin).astype(jnp.bfloat16)

    _get_roll_sign()   # resolve the roll convention eagerly (outside any jit trace)
    return p


# ----------------------------------------------------------------------------
# Plain-JAX reference (XLA convolutions)
# ----------------------------------------------------------------------------
def basic_block_reference(x_nchw, raw):
    x = jnp.transpose(x_nchw, (0, 2, 3, 1)).astype(jnp.float32)

    def conv(inp, w, stride, pad):
        return lax.conv_general_dilated(
            inp.astype(jnp.bfloat16),
            jnp.transpose(w, (2, 3, 1, 0)).astype(jnp.bfloat16),
            window_strides=(stride, stride), padding=[(pad, pad), (pad, pad)],
            dimension_numbers=("NHWC", "HWIO", "NHWC"),
            preferred_element_type=jnp.float32)

    s = raw["stride"]
    s1, b1 = _fold_bn(*raw["bn1"])
    s2, b2 = _fold_bn(*raw["bn2"])
    h = jnp.maximum(conv(x, raw["w1"], s, 1) * s1 + b1, 0.0)
    if "dw" in raw:
        ds, db = _fold_bn(*raw["dbn"])
        identity = conv(x, raw["dw"], s, 0) * ds + db
    else:
        identity = x
    out = jnp.maximum(conv(h, raw["w2"], 1, 1) * s2 + b2 + identity, 0.0)
    return jnp.transpose(out, (0, 3, 1, 2))


# ----------------------------------------------------------------------------
if __name__ == "__main__":
    key = jax.random.PRNGKey(0)
    k_a, k_b, k_x = jax.random.split(key, 3)

    x = jax.random.normal(k_x, (2, 32, 16, 16), jnp.float32)    # NCHW, like PyTorch

    raw_a = init_basic_block(k_a, 32, 32, stride=1)             # identity-residual block
    raw_b = init_basic_block(k_b, 32, 64, stride=2)             # downsample (1x1 conv + BN) block
    prep_a = prep_basic_block(raw_a)
    prep_b = prep_basic_block(raw_b)

    fwd = jax.jit(lambda inp: basic_block_forward(basic_block_forward(inp, prep_a), prep_b))
    out = jax.block_until_ready(fwd(x))

    assert out.shape == (2, 64, 8, 8), out.shape
    out_f32 = out.astype(jnp.float32)
    assert bool(jnp.all(jnp.isfinite(out_f32)))
    assert bool(jnp.all(out_f32 >= 0.0))

    ref_fn = jax.jit(lambda inp: basic_block_reference(basic_block_reference(inp, raw_a), raw_b))
    ref = jax.block_until_ready(ref_fn(x))
    max_diff = float(jnp.max(jnp.abs(out_f32 - ref)))
    # bf16 activations / residual / block outputs end-to-end (per perf review), f32 accumulation;
    # tolerance widened slightly vs a pure-f32 pipeline.
    assert bool(jnp.allclose(out_f32, ref, atol=5e-2, rtol=5e-2)), max_diff

    print("KERNEL_OK")
</pallas_src>

<mosaic_0001>
module attributes {stable_mosaic.version = 11 : i64} {
  func.func @_roll_probe_kernel(%arg0: memref<8x128xf32, #tpu.memory_space<vmem>>, %arg1: memref<8x128xf32, #tpu.memory_space<vmem>>) attributes {dimension_semantics = [], scalar_prefetch = 0 : i64, scratch_operands = 0 : i64, tpu.core_type = #tpu.core_type<tc>} {
    %c0 = arith.constant 0 : index
    %c0_0 = arith.constant 0 : index
    %0 = vector.load %arg0[%c0, %c0_0] : memref<8x128xf32, #tpu.memory_space<vmem>>, vector<8x128xf32>
    %c1_i32 = arith.constant 1 : i32
    %1 = tpu.dynamic_rotate %0 by %c1_i32 dim 1 : vector<8x128xf32>, i32 -> vector<8x128xf32>
    %c0_1 = arith.constant 0 : index
    %c0_2 = arith.constant 0 : index
    %2 = vector.load %arg1[%c0_1, %c0_2] : memref<8x128xf32, #tpu.memory_space<vmem>>, vector<8x128xf32>
    tpu.vector_store %arg1[%c0_1, %c0_2], %1 {strides = array<i32>} : memref<8x128xf32, #tpu.memory_space<vmem>>, vector<8x128xf32>,
    return
  }
}

</mosaic_0001>

<bundles_post_ra>
// kernel: tpu_custom_call.1
= control target key start
LH: loop header
LB: loop body
LE: loop exit
PB: predicated region body
PF: predicated region fallthrough
CT: control target
= control target key end

     0   :  { %6 = vsyncpa [#allocation3], 0  ;;  %s106_s0 = inlined_call_operand.hbm [shape: f32[8,128], index: 0, kind: input, shape index: {}]   ;;  %s107_s1 = inlined_call_operand.hbm [shape: f32[8,128], index: 1, kind: output, shape index: {}]  }
   0x1   :  { %7 = vsyncpa [#allocation4], 0  ;;  %s87_s6 = smov [#allocation2]  }
   0x2   :  { %s14_s7 = sshll.u32 %s87_s6, 4  ;;  %s15_s7 = int_to_ptr.vmem [resolvable:$true] %s14_s7 }
   0x3   :  { %s51_s8 = scalar_lea.vmem %s15_s7, 128  ;;  %p56_p1 = scmp.lt.s32.totalorder %s15_s7, %s15_s7 }
   0x4   :  { %p52_p0 = scmp.ne.s32.totalorder %s15_s7, %s51_s8  ;;  %p57_p2 = scmp.lt.s32.totalorder %s51_s8, %s51_s8 }
   0x6   :  { %p58_p3 = por %p57_p2, %p56_p1 }
   0x8   :  { %p59_p4 = pnand %p58_p3, %p52_p0 }
   0xa   :  { %62 = shalt.err (!%p59_p4)
}
   0xb   :  { %17 = dma.hbm_to_vmem [thread:$0]  %s106_s0, 128, %s15_s7, [#allocation3]  }
   0xc   :  { %83 = dma.done.wait [#allocation3], 128  }
   0xd   :  { %84 = vsyncadd [#allocation3], 4294967168  ;;  %v21_v0 = vld [vmem:[#allocation2] sm:$0xff]  ;;  %s88_s11 = smov 1   ;;  %s89_s12 = smov [#allocation5]  }
   0xe   :  { %22 = vrot.lane.b32.xlu0 %v21_v0, %s88_s11  ;;  %s31_s13 = sshll.u32 %s89_s12, 4  ;;  %s32_s13 = int_to_ptr.vmem [resolvable:$true] %s31_s13 }
   0xf   :  { %s63_s14 = scalar_lea.vmem %s32_s13, 128  ;;  %p68_p6 = scmp.lt.s32.totalorder %s32_s13, %s32_s13 }
  0x10   :  { %p64_p5 = scmp.ne.s32.totalorder %s32_s13, %s63_s14  ;;  %p69_p7 = scmp.lt.s32.totalorder %s63_s14, %s63_s14 }
  0x12   :  { %p70_p8 = por %p69_p7, %p68_p6 }
  0x14   :  { %p71_p9 = pnand %p70_p8, %p64_p5 }
  0x80   :  { %v23_v1 = vpop.permute.xlu0 %22 }
  0x81   :  { %24 = vst [vmem:[#allocation5] sm:$0xff] %v23_v1 }
  0x82   :  { %74 = shalt.err (!%p71_p9)
}
  0x83   :  { %34 = dma.vmem_to_hbm [thread:$0]  %s32_s13, 128, %s107_s1, [#allocation4]  }
  0x84   :  { %85 = dma.done.wait [#allocation4], 128  }
  0x85   :  { %86 = vsyncadd [#allocation4], 4294967168 }
  0x86   :  { %38 = vsyncpa [#allocation3], 1 }
  0x87   :  { %39 = vsyncpa [#allocation4], 1 }

</bundles_post_ra>
